<compile_context>
chip_gen: v7x
topology: tpu7x:2x2x1
jax: 0.10.0
libtpu: 0.0.40
codegen_flags: <defaults>
</compile_context>

<pallas_src>
import math
import jax
import jax.numpy as jnp
from jax import lax
from jax.experimental import pallas as pl
from jax.experimental.pallas import tpu as pltpu


def _round_up(x, m):
    return ((x + m - 1) // m) * m


def _vmem_spec():
    return pl.BlockSpec(memory_space=pltpu.MemorySpace.VMEM)


# ----------------------------------------------------------------------------
# Kernel 1: hoisted input projection  gates_x = x @ Wih^T + (bih + bhh)
# One MXU-friendly matmul over all (T*B) rows, parallel grid (uses both TCs
# on v7x); bias folded in so the recurrent kernel never touches it.
# ----------------------------------------------------------------------------
def _input_proj_kernel(x_ref, w_ref, b_ref, out_ref):
    out_ref[...] = (jnp.dot(x_ref[...], w_ref[...],
                            preferred_element_type=jnp.float32)
                    + b_ref[...]).astype(out_ref.dtype)


def input_projection(x_flat, w_T, b_row, *, tm=256):
    """x_flat: (M, Din); w_T: (Din, 4Hp); b_row: (1, 4Hp) -> (M, 4Hp)."""
    M, Din = x_flat.shape
    G = w_T.shape[1]
    tm = min(tm, M)                      # M is a multiple of 8 (padded batch)
    grid = (pl.cdiv(M, tm),)
    return pl.pallas_call(
        _input_proj_kernel,
        out_shape=jax.ShapeDtypeStruct((M, G), jnp.float32),
        grid_spec=pltpu.PrefetchScalarGridSpec(
            num_scalar_prefetch=0,
            grid=grid,
            in_specs=[
                pl.BlockSpec((tm, Din), lambda i: (i, 0)),
                pl.BlockSpec((Din, G), lambda i: (0, 0)),
                pl.BlockSpec((1, G), lambda i: (0, 0)),
            ],
            out_specs=pl.BlockSpec((tm, G), lambda i: (i, 0)),
        ),
        compiler_params=pltpu.CompilerParams(
            dimension_semantics=("parallel",)),
    )(x_flat, w_T, b_row)


# ----------------------------------------------------------------------------
# Kernel 2: the serial recurrence for one layer, ONE pallas_call.
# h/c are fori_loop carries (registers), only h @ Whh^T per step on the MXU;
# c_n stored once at the end, h_n recovered as out_seq[-1] by the wrapper.
# PyTorch gate order (i, f, g, o).
# TODO(synk): for very long T / large B*H, chunk the time axis with
#             pltpu.emit_pipeline instead of holding the whole sequence in VMEM.
# ----------------------------------------------------------------------------
def _lstm_recurrence_kernel(gx_ref, h0_ref, c0_ref, whh_ref, out_ref, cN_ref):
    T = gx_ref.shape[0]
    H = h0_ref.shape[-1]
    whh = whh_ref[...]                                   # hoisted, loaded once

    def step(t, carry):
        h, c = carry
        gates = gx_ref[t] + jnp.dot(h, whh, preferred_element_type=jnp.float32)
        i = jax.nn.sigmoid(gates[:, 0 * H:1 * H])
        f = jax.nn.sigmoid(gates[:, 1 * H:2 * H])
        g = jnp.tanh(gates[:, 2 * H:3 * H])
        o = jax.nn.sigmoid(gates[:, 3 * H:4 * H])
        c_new = f * c + i * g
        h_new = o * jnp.tanh(c_new)
        out_ref[t] = h_new.astype(out_ref.dtype)         # per-step sequence out
        return (h_new, c_new)

    _, c_n = lax.fori_loop(
        0, T, step,
        (h0_ref[...].astype(jnp.float32), c0_ref[...].astype(jnp.float32)),
        unroll=True)
    cN_ref[...] = c_n.astype(cN_ref.dtype)               # written once (last step)


def lstm_recurrence(gates_x, h0, c0, whh_T):
    """gates_x: (T, Bp, 4Hp); h0/c0: (Bp, Hp); whh_T: (Hp, 4Hp)."""
    T, B, _ = gates_x.shape
    H = h0.shape[-1]
    return pl.pallas_call(
        _lstm_recurrence_kernel,
        out_shape=(jax.ShapeDtypeStruct((T, B, H), jnp.float32),
                   jax.ShapeDtypeStruct((B, H), jnp.float32)),
        in_specs=[_vmem_spec(), _vmem_spec(), _vmem_spec(), _vmem_spec()],
        out_specs=(_vmem_spec(), _vmem_spec()),
    )(gates_x, h0, c0, whh_T)


# ----------------------------------------------------------------------------
# Kernel 3: fc (Linear) + LogSoftmax(dim=1).  Output dim padded to 128 so the
# reduction and store are lane-dense; padded columns carry a -1e30 bias so
# they contribute exp(.)==0 to the logsumexp.
# ----------------------------------------------------------------------------
def _fc_logsoftmax_kernel(h_ref, w_ref, b_ref, out_ref):
    logits = (jnp.dot(h_ref[...], w_ref[...], preferred_element_type=jnp.float32)
              + b_ref[...])                              # (Bp, Op)
    m = jnp.max(logits, axis=1, keepdims=True)
    shifted = logits - m
    lse = jnp.log(jnp.sum(jnp.exp(shifted), axis=1, keepdims=True))
    out_ref[...] = (shifted - lse).astype(out_ref.dtype)


def fc_logsoftmax(h_last, w_T, b_row):
    Bp = h_last.shape[0]
    Op = w_T.shape[1]
    return pl.pallas_call(
        _fc_logsoftmax_kernel,
        out_shape=jax.ShapeDtypeStruct((Bp, Op), jnp.float32),
        in_specs=[_vmem_spec(), _vmem_spec(), _vmem_spec()],
        out_specs=_vmem_spec(),
    )(h_last, w_T, b_row)


# ----------------------------------------------------------------------------
# Parameter init: PyTorch nn.LSTM / nn.Linear layout, then re-laid-out per
# gate into lane-aligned padded blocks.  Padded hidden units have zero
# weights/bias -> their cell/hidden state stays exactly zero, so padding does
# not change the math on the real units.
# ----------------------------------------------------------------------------
def init_params(key, input_size, hidden_size, output_size, num_layers):
    H = hidden_size
    Hp = _round_up(H, 128)
    O = output_size
    Op = _round_up(O, 128)
    bound = 1.0 / math.sqrt(H)
    params = {"lstm": [], "H": H, "Hp": Hp, "O": O, "Op": Op,
              "input_size": input_size}

    def pad_gates(w, cols, cols_p):
        # w: (4H, cols) gate-major [i;f;g;o] -> (4Hp, cols_p), per-gate padded.
        wg = w.reshape(4, H, cols)
        wg = jnp.pad(wg, ((0, 0), (0, Hp - H), (0, cols_p - cols)))
        return wg.reshape(4 * Hp, cols_p)

    for layer in range(num_layers):
        din = input_size if layer == 0 else H
        din_p = input_size if layer == 0 else Hp
        key, k1, k2, k3, k4 = jax.random.split(key, 5)
        wih = jax.random.uniform(k1, (4 * H, din), jnp.float32, -bound, bound)
        whh = jax.random.uniform(k2, (4 * H, H), jnp.float32, -bound, bound)
        bih = jax.random.uniform(k3, (4 * H,), jnp.float32, -bound, bound)
        bhh = jax.random.uniform(k4, (4 * H,), jnp.float32, -bound, bound)
        b = (bih + bhh).reshape(4, H)
        b_p = jnp.pad(b, ((0, 0), (0, Hp - H))).reshape(1, 4 * Hp)
        params["lstm"].append({
            "wih_T": pad_gates(wih, din, din_p).T,        # (din_p, 4Hp)
            "whh_T": pad_gates(whh, H, Hp).T,             # (Hp, 4Hp)
            "b": b_p,                                     # (1, 4Hp)
        })

    key, k5, k6 = jax.random.split(key, 3)
    fb = 1.0 / math.sqrt(H)
    fc_w = jax.random.uniform(k5, (O, H), jnp.float32, -fb, fb)
    fc_b = jax.random.uniform(k6, (O,), jnp.float32, -fb, fb)
    fc_w_p = jnp.pad(fc_w, ((0, Op - O), (0, Hp - H)))    # (Op, Hp)
    fc_b_p = jnp.pad(fc_b, (0, Op - O))
    neg_mask = jnp.concatenate(
        [jnp.zeros((O,), jnp.float32), jnp.full((Op - O,), -1e30, jnp.float32)])
    params["fc_w_T"] = fc_w_p.T                           # (Hp, Op)
    params["fc_b"] = (fc_b_p + neg_mask).reshape(1, Op)   # (1, Op)
    return params


# ----------------------------------------------------------------------------
# Model wrapper: multi-layer LSTM -> last step -> fc -> log_softmax
# ----------------------------------------------------------------------------
def lstm_model_forward(x, hidden, params):
    """x: (B, T, input_size); hidden = (h0, c0), each (num_layers, B, H)."""
    h0, c0 = hidden
    B, T, _ = x.shape
    H, Hp, O, Op = params["H"], params["Hp"], params["O"], params["Op"]
    Bp = _round_up(B, 8)

    x_p = jnp.pad(x, ((0, Bp - B), (0, 0), (0, 0)))
    h0_p = jnp.pad(h0, ((0, 0), (0, Bp - B), (0, Hp - H)))
    c0_p = jnp.pad(c0, ((0, 0), (0, Bp - B), (0, Hp - H)))

    layer_in = jnp.transpose(x_p, (1, 0, 2))              # time-major (T, Bp, Din)
    h_fin, c_fin = [], []
    for l, p in enumerate(params["lstm"]):
        din_l = layer_in.shape[-1]
        # Hoisted, parallel input projection (bias folded in).
        gx = input_projection(layer_in.reshape(T * Bp, din_l), p["wih_T"], p["b"])
        gx = gx.reshape(T, Bp, 4 * Hp)
        # Serial recurrence in a single kernel invocation.
        out_seq, c_n = lstm_recurrence(gx, h0_p[l], c0_p[l], p["whh_T"])
        h_fin.append(out_seq[-1][:B, :H])                  # h_n == out_seq[-1]
        c_fin.append(c_n[:B, :H])
        layer_in = out_seq                                 # (T, Bp, Hp)

    logp_p = fc_logsoftmax(layer_in[-1], params["fc_w_T"], params["fc_b"])
    logp = logp_p[:B, :O]
    return logp, (jnp.stack(h_fin), jnp.stack(c_fin))


if __name__ == "__main__":
    input_size, hidden_size, output_size, num_layers = 16, 32, 10, 2
    batch, seq = 4, 8

    key = jax.random.PRNGKey(0)
    key, kx = jax.random.split(key)
    x = jax.random.normal(kx, (batch, seq, input_size), jnp.float32)

    params = init_params(key, input_size, hidden_size, output_size, num_layers)

    # init_hidden(batch_size): zeros for both h0 and c0
    h0 = jnp.zeros((num_layers, batch, hidden_size), jnp.float32)
    c0 = jnp.zeros((num_layers, batch, hidden_size), jnp.float32)

    logp, (h_n, c_n) = lstm_model_forward(x, (h0, c0), params)
    jax.block_until_ready((logp, h_n, c_n))

    assert logp.shape == (batch, output_size)
    assert h_n.shape == (num_layers, batch, hidden_size)
    assert c_n.shape == (num_layers, batch, hidden_size)
    assert bool(jnp.all(jnp.isfinite(logp)))
    print("KERNEL_OK")
</pallas_src>

<mosaic_0001>
module attributes {stable_mosaic.version = 11 : i64} {
  func.func @_input_proj_kernel(%arg0: i32, %arg1: memref<64x16xf32, #tpu.memory_space<vmem>>, %arg2: memref<16x512xf32, #tpu.memory_space<vmem>>, %arg3: memref<1x512xf32, #tpu.memory_space<vmem>>, %arg4: memref<64x512xf32, #tpu.memory_space<vmem>>) attributes {dimension_semantics = [#tpu.dimension_semantics<parallel>], iteration_bounds = array<i64: 1>, scalar_prefetch = 0 : i64, scratch_operands = 0 : i64, tpu.core_type = #tpu.core_type<tc>, window_params = [{transform_indices = @transform_0, window_bounds = array<i64: 64, 16>}, {pipeline_mode = #tpu.pipeline_mode<synchronous>, transform_indices = @transform_1, window_bounds = array<i64: 16, 512>}, {pipeline_mode = #tpu.pipeline_mode<synchronous>, transform_indices = @transform_2, window_bounds = array<i64: 1, 512>}, {transform_indices = @transform_3, window_bounds = array<i64: 64, 512>}]} {
    %c0 = arith.constant 0 : index
    %c0_0 = arith.constant 0 : index
    %0 = vector.load %arg1[%c0, %c0_0] : memref<64x16xf32, #tpu.memory_space<vmem>>, vector<64x16xf32>
    %c0_1 = arith.constant 0 : index
    %c0_2 = arith.constant 0 : index
    %1 = vector.load %arg2[%c0_1, %c0_2] : memref<16x512xf32, #tpu.memory_space<vmem>>, vector<16x512xf32>
    %cst = arith.constant dense<0.000000e+00> : vector<64x512xf32>
    %2 = tpu.matmul %0, %1, %cst {dimension_numbers = #tpu.dot_dimension_numbers<[1], [0], [0], [1], [0, 0, 1, 1], [], []>} : vector<64x16xf32>, vector<16x512xf32>, vector<64x512xf32> -> vector<64x512xf32>
    %c0_3 = arith.constant 0 : index
    %c0_4 = arith.constant 0 : index
    %3 = vector.load %arg3[%c0_3, %c0_4] : memref<1x512xf32, #tpu.memory_space<vmem>>, vector<1x512xf32>
    %4 = vector.broadcast %3 : vector<1x512xf32> to vector<64x512xf32>
    %5 = arith.addf %2, %4 : vector<64x512xf32>
    %c0_5 = arith.constant 0 : index
    %c0_6 = arith.constant 0 : index
    %6 = vector.load %arg4[%c0_5, %c0_6] : memref<64x512xf32, #tpu.memory_space<vmem>>, vector<64x512xf32>
    tpu.vector_store %arg4[%c0_5, %c0_6], %5 {strides = array<i32>} : memref<64x512xf32, #tpu.memory_space<vmem>>, vector<64x512xf32>,
    return
  }
  func.func @transform_0(%arg0: i32) -> (i32, i32) {
    %c0_i32 = arith.constant 0 : i32
    %c0_i32_0 = arith.constant 0 : i32
    return %arg0, %c0_i32 : i32, i32
  }
  func.func @transform_1(%arg0: i32) -> (i32, i32) {
    %c0_i32 = arith.constant 0 : i32
    %c0_i32_0 = arith.constant 0 : i32
    %c0_i32_1 = arith.constant 0 : i32
    return %c0_i32, %c0_i32_0 : i32, i32
  }
  func.func @transform_2(%arg0: i32) -> (i32, i32) {
    %c0_i32 = arith.constant 0 : i32
    %c0_i32_0 = arith.constant 0 : i32
    %c0_i32_1 = arith.constant 0 : i32
    return %c0_i32, %c0_i32_0 : i32, i32
  }
  func.func @transform_3(%arg0: i32) -> (i32, i32) {
    %c0_i32 = arith.constant 0 : i32
    %c0_i32_0 = arith.constant 0 : i32
    return %arg0, %c0_i32 : i32, i32
  }
}

</mosaic_0001>

<bundles_post_ra>
// kernel: tpu_custom_call.1
= control target key start
LH: loop header
LB: loop body
LE: loop exit
PB: predicated region body
PF: predicated region fallthrough
CT: control target
= control target key end

     0   :  { %v404_v7 = vmov 0.0   ;;  %vm53_vm0 = vcmask 130048   ;;  %s547_s0 = inlined_call_operand.vmem [shape: f32[64,16], index: 0, kind: input, shape index: {}]   ;;  %s548_s1 = inlined_call_operand.vmem [shape: f32[16,512], index: 1, kind: input, shape index: {}]   ;;  %s549_s2 = inlined_call_operand.vmem [shape: f32[1,512], index: 2, kind: input, shape index: {}]   ;;  %s550_s3 = inlined_call_operand.hbm [shape: f32[64,512], index: 3, kind: output, shape index: {}]  }
   0x1   :  { %v24_v0 = vld [vmem:[%s548_s1 + $0x8] sm:$0xff]  ;;  %v26_v2 = vld [vmem:[%s548_s1 + $0x18] sm:$0xff]  ;;  %v23_v5 = vld [vmem:[%s548_s1] sm:$0xff]  ;;  %142 = vmatprep.mubr.f32.mxu0 %v404_v7  ;;  %255 = vmatprep.mubr.f32.mxu1 %v404_v7 }
   0x2   :  { %v28_v1 = vld [vmem:[%s548_s1 + $0x28] sm:$0xff]  ;;  %v30_v4 = vld [vmem:[%s548_s1 + $0x38] sm:$0xff]  ;;  %v27_v6 = vld [vmem:[%s548_s1 + $0x20] sm:$0xff] }
   0x3   :  { %v368_v3 = vpack.c.bf16 %v28_v1, %v24_v0  ;;  %v372_v8 = vpack.c.bf16 %v30_v4, %v26_v2  ;;  %v370_v9 = vpack.c.bf16 %v27_v6, %v23_v5  ;;  %v25_v10 = vld [vmem:[%s548_s1 + $0x10] sm:$0xff]  ;;  %v15_v13 = vld [vmem:[%s547_s0] sm:$0xff] }
   0x4   :  { %v29_v11 = vld [vmem:[%s548_s1 + $0x30] sm:$0xff] }
   0x5   :  { %369 = vmatprep.subr.bf16.mxu0 %v368_v3  ;;  %v374_v12 = vpack.c.bf16 %v29_v11, %v25_v10  ;;  %373 = vmatprep.subr.bf16.mxu1 %v372_v8 }
   0x6   :  { %371 = vmatpush1.bf16.msra.mxu0 %v370_v9 }
   0x7   :  { %375 = vmatpush1.bf16.msra.mxu1 %v374_v12 }
   0x8   :  { %8 = vsyncpa [#allocation3], 0  ;;  %v16_v14 = vld [vmem:[%s547_s0 + $0x8] sm:$0xff]  ;;  %v17_v15 = vld [vmem:[%s547_s0 + $0x10] sm:$0xff]  ;;  %v33_v21 = vlaneseq }
   0x9   :  { %352 = vmatmul.mubr.msk.f32.vlgmr.msra.gmra.mrb[0].mxu0 %vm53_vm0, %v15_v13  ;;  %v18_v16 = vld [vmem:[%s547_s0 + $0x18] sm:$0xff]  ;;  %v19_v17 = vld [vmem:[%s547_s0 + $0x20] sm:$0xff]  ;;  %v20_v18 = vld [vmem:[%s547_s0 + $0x28] sm:$0xff] }
   0xa   :  { %360 = vmatmul.mubr.msk.f32.vlgmr.msra.gmra.mrb[0].mxu1 %vm53_vm0, %v15_v13  ;;  %148 = vmatprep.mubr.f32.mxu0 %v404_v7  ;;  %v21_v19 = vld [vmem:[%s547_s0 + $0x30] sm:$0xff]  ;;  %v22_v20 = vld [vmem:[%s547_s0 + $0x38] sm:$0xff]  ;;  %v34_v22 = vshrl.u32 %v33_v21, 7  ;;  %v31_v24 = vld [vmem:[%s549_s2] sm:$0xf]  ;;  %s405_s0 = smov [#allocation2]  }
   0xb   :  { %261 = vmatprep.mubr.f32.mxu1 %v404_v7  ;;  %s341_s2 = sshll.u32 %s405_s0, 4  ;;  %s342_s2 = int_to_ptr.vmem [resolvable:$true] %s341_s2 }
   0xc   :  { %v35_v23 = vsub.s32 0, %v34_v22  ;;  %v43_v25 = vsub.s32 2, %v34_v22  ;;  %v39_v26 = vsub.s32 1, %v34_v22  ;;  %v47_v27 = vsub.s32 3, %v34_v22  ;;  %s380_s18 = scalar_lea.vmem %s342_s2, 4096  ;;  %p385_p1 = scmp.lt.s32.totalorder %s342_s2, %s342_s2 }
   0xd   :  { %353 = vmatmul.mubr.msk.f32.gmra.mrb[2].mxu0 %vm53_vm0, %v16_v14  ;;  %p381_p0 = scmp.ne.s32.totalorder %s342_s2, %s380_s18  ;;  %p386_p2 = scmp.lt.s32.totalorder %s380_s18, %s380_s18 }
   0xe   :  { %361 = vmatmul.mubr.msk.f32.gmra.mrb[2].mxu1 %vm53_vm0, %v16_v14  ;;  %154 = vmatprep.mubr.f32.mxu0 %v404_v7  ;;  %v495_v28 = vrot.slane %v31_v24, %v35_v23  ;;  %v497_v29 = vrot.slane %v31_v24, %v43_v25  ;;  %v499_v30 = vrot.slane %v31_v24, %v39_v26 }
   0xf   :  { %267 = vmatprep.mubr.f32.mxu1 %v404_v7  ;;  %v501_v31 = vrot.slane %v31_v24, %v47_v27  ;;  %p387_p3 = por %p386_p2, %p385_p1 }
  0x11   :  { %354 = vmatmul.mubr.msk.f32.gmra.mrb[4].mxu0 %vm53_vm0, %v17_v15  ;;  %p388_p4 = pnand %p387_p3, %p381_p0 }
  0x12   :  { %362 = vmatmul.mubr.msk.f32.gmra.mrb[4].mxu1 %vm53_vm0, %v17_v15  ;;  %160 = vmatprep.mubr.f32.mxu0 %v404_v7 }
  0x13   :  { %273 = vmatprep.mubr.f32.mxu1 %v404_v7 }
  0x15   :  { %355 = vmatmul.mubr.msk.f32.gmra.mrb[6].mxu0 %vm53_vm0, %v18_v16 }
  0x16   :  { %363 = vmatmul.mubr.msk.f32.gmra.mrb[6].mxu1 %vm53_vm0, %v18_v16  ;;  %166 = vmatprep.mubr.f32.mxu0 %v404_v7 }
  0x17   :  { %279 = vmatprep.mubr.f32.mxu1 %v404_v7 }
  0x19   :  { %356 = vmatmul.mubr.msk.f32.gmra.mrb[8].mxu0 %vm53_vm0, %v19_v17 }
  0x1a   :  { %364 = vmatmul.mubr.msk.f32.gmra.mrb[8].mxu1 %vm53_vm0, %v19_v17  ;;  %172 = vmatprep.mubr.f32.mxu0 %v404_v7 }
  0x1b   :  { %285 = vmatprep.mubr.f32.mxu1 %v404_v7 }
  0x1d   :  { %357 = vmatmul.mubr.msk.f32.gmra.mrb[10].mxu0 %vm53_vm0, %v20_v18 }
  0x1e   :  { %365 = vmatmul.mubr.msk.f32.gmra.mrb[10].mxu1 %vm53_vm0, %v20_v18  ;;  %178 = vmatprep.mubr.f32.mxu0 %v404_v7 }
  0x1f   :  { %291 = vmatprep.mubr.f32.mxu1 %v404_v7 }
  0x21   :  { %358 = vmatmul.mubr.msk.f32.gmra.mrb[12].mxu0 %vm53_vm0, %v21_v19 }
  0x22   :  { %366 = vmatmul.mubr.msk.f32.gmra.mrb[12].mxu1 %vm53_vm0, %v21_v19  ;;  %184 = vmatprep.mubr.f32.mxu0 %v404_v7 }
  0x23   :  { %297 = vmatprep.mubr.f32.mxu1 %v404_v7 }
  0x25   :  { %359 = vmatmul.mubr.msk.f32.gmra.mrb[14].mxu0 %vm53_vm0, %v22_v20 }
  0x26   :  { %367 = vmatmul.mubr.msk.f32.gmra.mrb[14].mxu1 %vm53_vm0, %v22_v20 }
  0xdc   :  { %v144_v32 = vpop.f32.mrb[0].mxu0 }
  0xdd   :  { %v145_v33 = vadd.f32 %v144_v32, %v495_v28  ;;  %v257_v34 = vpop.f32.mrb[0].mxu1  ;;  %v146_v35 = vpop.f32.mrb[1].mxu0 }
  0xde   :  { %v258_v36 = vadd.f32 %v257_v34, %v497_v29  ;;  %v147_v37 = vadd.f32 %v146_v35, %v499_v30  ;;  %v259_v38 = vpop.f32.mrb[1].mxu1 }
  0xdf   :  { %304 = vst [vmem:[#allocation2] sm:$0xff] %v145_v33  ;;  %v260_v39 = vadd.f32 %v259_v38, %v501_v31 }
  0xe0   :  { %306 = vst [vmem:[#allocation2 + $0x10] sm:$0xff] %v258_v36  ;;  %305 = vst [vmem:[#allocation2 + $0x8] sm:$0xff] %v147_v37  ;;  %v150_v40 = vpop.f32.mrb[2].mxu0 }
  0xe1   :  { %307 = vst [vmem:[#allocation2 + $0x18] sm:$0xff] %v260_v39  ;;  %v151_v41 = vadd.f32 %v150_v40, %v495_v28  ;;  %v263_v42 = vpop.f32.mrb[2].mxu1  ;;  %v152_v43 = vpop.f32.mrb[3].mxu0 }
  0xe2   :  { %v264_v44 = vadd.f32 %v263_v42, %v497_v29  ;;  %v153_v45 = vadd.f32 %v152_v43, %v499_v30  ;;  %v265_v46 = vpop.f32.mrb[3].mxu1 }
  0xe3   :  { %308 = vst [vmem:[#allocation2 + $0x20] sm:$0xff] %v151_v41  ;;  %v266_v47 = vadd.f32 %v265_v46, %v501_v31 }
  0xe4   :  { %310 = vst [vmem:[#allocation2 + $0x30] sm:$0xff] %v264_v44  ;;  %309 = vst [vmem:[#allocation2 + $0x28] sm:$0xff] %v153_v45  ;;  %v156_v48 = vpop.f32.mrb[4].mxu0 }
  0xe5   :  { %311 = vst [vmem:[#allocation2 + $0x38] sm:$0xff] %v266_v47  ;;  %v157_v49 = vadd.f32 %v156_v48, %v495_v28  ;;  %v269_v50 = vpop.f32.mrb[4].mxu1  ;;  %v158_v51 = vpop.f32.mrb[5].mxu0 }
  0xe6   :  { %v270_v52 = vadd.f32 %v269_v50, %v497_v29  ;;  %v159_v53 = vadd.f32 %v158_v51, %v499_v30  ;;  %v271_v54 = vpop.f32.mrb[5].mxu1 }
  0xe7   :  { %312 = vst [vmem:[#allocation2 + $0x40] sm:$0xff] %v157_v49  ;;  %v272_v55 = vadd.f32 %v271_v54, %v501_v31 }
  0xe8   :  { %314 = vst [vmem:[#allocation2 + $0x50] sm:$0xff] %v270_v52  ;;  %313 = vst [vmem:[#allocation2 + $0x48] sm:$0xff] %v159_v53  ;;  %v162_v56 = vpop.f32.mrb[6].mxu0 }
  0xe9   :  { %315 = vst [vmem:[#allocation2 + $0x58] sm:$0xff] %v272_v55  ;;  %v163_v57 = vadd.f32 %v162_v56, %v495_v28  ;;  %v275_v58 = vpop.f32.mrb[6].mxu1  ;;  %v164_v59 = vpop.f32.mrb[7].mxu0 }
  0xea   :  { %v276_v60 = vadd.f32 %v275_v58, %v497_v29  ;;  %v165_v61 = vadd.f32 %v164_v59, %v499_v30  ;;  %v277_v62 = vpop.f32.mrb[7].mxu1 }
  0xeb   :  { %316 = vst [vmem:[#allocation2 + $0x60] sm:$0xff] %v163_v57  ;;  %v278_v63 = vadd.f32 %v277_v62, %v501_v31 }
  0xec   :  { %318 = vst [vmem:[#allocation2 + $0x70] sm:$0xff] %v276_v60  ;;  %317 = vst [vmem:[#allocation2 + $0x68] sm:$0xff] %v165_v61  ;;  %v168_v0 = vpop.f32.mrb[8].mxu0 }
  0xed   :  { %319 = vst [vmem:[#allocation2 + $0x78] sm:$0xff] %v278_v63  ;;  %v169_v1 = vadd.f32 %v168_v0, %v495_v28  ;;  %v281_v2 = vpop.f32.mrb[8].mxu1  ;;  %v170_v3 = vpop.f32.mrb[9].mxu0 }
  0xee   :  { %v282_v4 = vadd.f32 %v281_v2, %v497_v29  ;;  %v171_v5 = vadd.f32 %v170_v3, %v499_v30  ;;  %v283_v6 = vpop.f32.mrb[9].mxu1 }
  0xef   :  { %320 = vst [vmem:[#allocation2 + $0x80] sm:$0xff] %v169_v1  ;;  %v284_v7 = vadd.f32 %v283_v6, %v501_v31 }
  0xf0   :  { %322 = vst [vmem:[#allocation2 + $0x90] sm:$0xff] %v282_v4  ;;  %321 = vst [vmem:[#allocation2 + $0x88] sm:$0xff] %v171_v5  ;;  %v174_v8 = vpop.f32.mrb[10].mxu0 }
  0xf1   :  { %323 = vst [vmem:[#allocation2 + $0x98] sm:$0xff] %v284_v7  ;;  %v175_v9 = vadd.f32 %v174_v8, %v495_v28  ;;  %v287_v10 = vpop.f32.mrb[10].mxu1  ;;  %v176_v11 = vpop.f32.mrb[11].mxu0 }
  0xf2   :  { %v288_v12 = vadd.f32 %v287_v10, %v497_v29  ;;  %v177_v13 = vadd.f32 %v176_v11, %v499_v30  ;;  %v289_v14 = vpop.f32.mrb[11].mxu1 }
  0xf3   :  { %324 = vst [vmem:[#allocation2 + $0xa0] sm:$0xff] %v175_v9  ;;  %v290_v15 = vadd.f32 %v289_v14, %v501_v31 }
  0xf4   :  { %326 = vst [vmem:[#allocation2 + $0xb0] sm:$0xff] %v288_v12  ;;  %325 = vst [vmem:[#allocation2 + $0xa8] sm:$0xff] %v177_v13  ;;  %v180_v16 = vpop.f32.mrb[12].mxu0 }
  0xf5   :  { %327 = vst [vmem:[#allocation2 + $0xb8] sm:$0xff] %v290_v15  ;;  %v181_v17 = vadd.f32 %v180_v16, %v495_v28  ;;  %v293_v18 = vpop.f32.mrb[12].mxu1  ;;  %v182_v19 = vpop.f32.mrb[13].mxu0 }
  0xf6   :  { %v294_v20 = vadd.f32 %v293_v18, %v497_v29  ;;  %v183_v21 = vadd.f32 %v182_v19, %v499_v30  ;;  %v295_v22 = vpop.f32.mrb[13].mxu1 }
  0xf7   :  { %328 = vst [vmem:[#allocation2 + $0xc0] sm:$0xff] %v181_v17  ;;  %v296_v23 = vadd.f32 %v295_v22, %v501_v31 }
  0xf8   :  { %330 = vst [vmem:[#allocation2 + $0xd0] sm:$0xff] %v294_v20  ;;  %329 = vst [vmem:[#allocation2 + $0xc8] sm:$0xff] %v183_v21  ;;  %v186_v24 = vpop.f32.mrb[14].mxu0 }
  0xf9   :  { %331 = vst [vmem:[#allocation2 + $0xd8] sm:$0xff] %v296_v23  ;;  %v187_v25 = vadd.f32 %v186_v24, %v495_v28  ;;  %v299_v26 = vpop.f32.mrb[14].mxu1  ;;  %v188_v27 = vpop.f32.mrb[15].mxu0 }
  0xfa   :  { %v300_v32 = vadd.f32 %v299_v26, %v497_v29  ;;  %v189_v33 = vadd.f32 %v188_v27, %v499_v30  ;;  %v301_v34 = vpop.f32.mrb[15].mxu1 }
  0xfb   :  { %332 = vst [vmem:[#allocation2 + $0xe0] sm:$0xff] %v187_v25  ;;  %v302_v35 = vadd.f32 %v301_v34, %v501_v31 }
  0xfc   :  { %334 = vst [vmem:[#allocation2 + $0xf0] sm:$0xff] %v300_v32  ;;  %333 = vst [vmem:[#allocation2 + $0xe8] sm:$0xff] %v189_v33 }
  0xfd   :  { %335 = vst [vmem:[#allocation2 + $0xf8] sm:$0xff] %v302_v35 }
  0xfe   :  { %391 = shalt.err (!%p388_p4)
}
  0xff   :  { %s392_s21 = scalar_lea.hbm %s550_s3, 4096 }
 0x100   :  { %p393_p5 = scmp.ne.s32.totalorder %s550_s3, %s392_s21  ;;  %p396_p6 = scmp.lt.u32.totalorder %s392_s21, %s550_s3 }
 0x102   :  { %p398_p7 = pnand %p396_p6, %p393_p5 }
 0x104   :  { %401 = shalt.err (!%p398_p7)
}
 0x105   :  { %s406_s26 = smov 512   ;;  %s407_s27 = smov 32  }
 0x106   :  { %347 = dma.vmem_to_hbm [thread:$0]  %s342_s2, 4096, %s550_s3, [#allocation3], %s406_s26, %s406_s26, %s407_s27  }
 0x107   :  { %402 = dma.done.wait [#allocation3], 4096  }
 0x108   :  { %403 = vsyncadd [#allocation3], 4294963200 }
 0x109   :  { %351 = vsyncpa [#allocation3], 1 }

</bundles_post_ra>
